<compile_context>
chip_gen: v7x
topology: tpu7x:2x2x1
jax: 0.10.0
libtpu: 0.0.40
codegen_flags: <defaults>
</compile_context>

<pallas_src>
import functools

import jax
import jax.numpy as jnp
from jax.experimental import pallas as pl
from jax.experimental.pallas import tpu as pltpu


def _se_kernel(x_ref, w1_ref, b1_ref, w2_ref, b2_ref, o_ref, *, C, Cr, HW):
    # x_ref / o_ref: (nb, C*HW) block — batch on sublanes, (channel, spatial)
    # flattened on lanes. Channel c occupies lanes [c*HW, (c+1)*HW).
    # w1_ref (C, Cr), b1_ref (1, Cr), w2_ref (Cr, C), b2_ref (1, C): SMEM.
    inv_hw = 1.0 / HW

    # 1) AdaptiveAvgPool2d(1): per-(batch, channel) mean = lane reduce of each
    #    HW-wide chunk, accumulated in f32. pooled[c]: (nb, 1).
    pooled = []
    for c in range(C):
        xc = x_ref[:, c * HW:(c + 1) * HW]
        pooled.append(
            jnp.sum(xc.astype(jnp.float32), axis=-1, keepdims=True) * inv_hw)

    # 2) Conv2d(C, Cr, 1) + ReLU on the pooled vector. Channel dims are tiny,
    #    so unroll them and use SMEM scalar weights on the VPU (keeps the MXU
    #    and any relayouts off the critical path).
    hs = []
    for r in range(Cr):
        acc = pooled[0] * w1_ref[0, r]
        for c in range(1, C):
            acc = acc + pooled[c] * w1_ref[c, r]
        hs.append(jnp.maximum(acc + b1_ref[0, r], 0.0))        # (nb, 1)

    # 3) Conv2d(Cr, C, 1) + Sigmoid + excitation, streaming channel chunks.
    for c in range(C):
        acc = hs[0] * w2_ref[0, c]
        for r in range(1, Cr):
            acc = acc + hs[r] * w2_ref[r, c]
        s = jax.nn.sigmoid(acc + b2_ref[0, c])                  # (nb, 1) f32
        xc = x_ref[:, c * HW:(c + 1) * HW]                      # re-read from VMEM
        o_ref[:, c * HW:(c + 1) * HW] = xc * s.astype(xc.dtype)


def squeeze_forward(x_nchw, w1, b1, w2, b2):
    """x_nchw: (N, C, H, W).
    w1: (C, Cr)  (transposed PyTorch conv1 weight), b1: (1, Cr)
    w2: (Cr, C)  (transposed PyTorch conv2 weight), b2: (1, C)
    Returns (N, C, H, W)."""
    N, C, H, W = x_nchw.shape
    Cr = w1.shape[1]
    HW = H * W
    CHW = C * HW
    itemsize = jnp.dtype(x_nchw.dtype).itemsize

    # Channels folded into the lane axis: pure reshape of contiguous NCHW.
    # (CHW is a multiple of 128 here -> fully dense, unmasked stores.)
    x2 = x_nchw.reshape(N, CHW)

    # Per-generation block budget from physical VMEM (v5e/v6e 128 MiB, v7x 64 MiB).
    try:
        vmem_cap = int(pltpu.get_tpu_info().vmem_capacity_bytes)
    except Exception:
        vmem_cap = 128 * 1024 * 1024
    block_budget = int(min(4 << 20, max(1 << 20, vmem_cap // 32)))

    bytes_per_batch = CHW * itemsize
    sub = 8 * max(1, 4 // itemsize)      # sublane packing: 8 f32 / 16 bf16 / 32 i8
    if N <= sub:
        nb = N                            # single block; full-dim sublane block
    else:
        nb = min(N, max(1, block_budget // bytes_per_batch))
        nb = max(sub, (nb // sub) * sub)  # keep sublanes fully packed
        if pl.cdiv(N, nb) < 2:
            # Keep >= 2 grid steps so the "parallel" axis can shard across
            # v7x's two TensorCores (free on single-TC v5e/v6e).
            nb = max(sub, (pl.cdiv(N, 2) // sub) * sub)
    grid = (pl.cdiv(N, nb),)
    block_bytes = nb * bytes_per_batch

    # in + out, double-buffered, plus headroom for gate temporaries.
    vmem_limit = int(min(vmem_cap * 3 // 4,
                         max(32 << 20, 4 * block_bytes + (8 << 20))))

    kernel = functools.partial(_se_kernel, C=C, Cr=Cr, HW=HW)

    out = pl.pallas_call(
        kernel,
        out_shape=jax.ShapeDtypeStruct((N, CHW), x2.dtype),
        grid_spec=pltpu.PrefetchScalarGridSpec(
            num_scalar_prefetch=0,
            grid=grid,
            in_specs=[
                pl.BlockSpec((nb, CHW), lambda n: (n, 0)),
                pl.BlockSpec(memory_space=pltpu.MemorySpace.SMEM),  # w1
                pl.BlockSpec(memory_space=pltpu.MemorySpace.SMEM),  # b1
                pl.BlockSpec(memory_space=pltpu.MemorySpace.SMEM),  # w2
                pl.BlockSpec(memory_space=pltpu.MemorySpace.SMEM),  # b2
            ],
            out_specs=pl.BlockSpec((nb, CHW), lambda n: (n, 0)),
        ),
        compiler_params=pltpu.CompilerParams(
            dimension_semantics=("parallel",),
            vmem_limit_bytes=vmem_limit),
        cost_estimate=pl.CostEstimate(
            flops=3 * N * CHW + 4 * N * C * Cr,
            transcendentals=2 * N * C,
            bytes_accessed=2 * N * CHW * itemsize),
    )(x2, w1, b1, w2, b2)

    return out.reshape(N, C, H, W)


def _reference(x_nchw, w1, b1, w2, b2):
    # Pure-JAX reference of the PyTorch module (NCHW semantics).
    pooled = jnp.mean(x_nchw, axis=(2, 3))                 # (N, C)
    h = jnp.maximum(pooled @ w1 + b1, 0.0)                 # (N, Cr)
    s = jax.nn.sigmoid(h @ w2 + b2)                        # (N, C)
    return x_nchw * s[:, :, None, None]


if __name__ == "__main__":
    # Module config: squeeze(in_chan=4, reduce=2) ; input (2, 4, 16, 16)
    N, C, H, W = 2, 4, 16, 16
    reduce = 2
    Cr = C // reduce

    key = jax.random.PRNGKey(0)
    kx, k1, kb1, k2, kb2 = jax.random.split(key, 5)

    x = jax.random.normal(kx, (N, C, H, W), dtype=jnp.float32)

    # Deterministic parameter init (PyTorch conv weight (Cout, Cin, 1, 1) -> dense).
    w1 = jax.random.normal(k1, (C, Cr), dtype=jnp.float32) * 0.1   # (Cin, Cout) of conv1
    b1 = jax.random.normal(kb1, (1, Cr), dtype=jnp.float32) * 0.1
    w2 = jax.random.normal(k2, (Cr, C), dtype=jnp.float32) * 0.1   # (Cin, Cout) of conv2
    b2 = jax.random.normal(kb2, (1, C), dtype=jnp.float32) * 0.1

    out = squeeze_forward(x, w1, b1, w2, b2)
    out = jax.block_until_ready(out)

    ref = _reference(x, w1, b1, w2, b2)
    assert out.shape == (N, C, H, W)
    assert jnp.allclose(out, ref, atol=1e-5, rtol=1e-5), "mismatch vs reference"

    print("KERNEL_OK")
</pallas_src>

<mosaic_0001>
module attributes {stable_mosaic.version = 11 : i64} {
  func.func @_se_kernel(%arg0: i32, %arg1: memref<2x1024xf32, #tpu.memory_space<vmem>>, %arg2: memref<4x2xf32, #tpu.memory_space<smem>>, %arg3: memref<1x2xf32, #tpu.memory_space<smem>>, %arg4: memref<2x4xf32, #tpu.memory_space<smem>>, %arg5: memref<1x4xf32, #tpu.memory_space<smem>>, %arg6: memref<2x1024xf32, #tpu.memory_space<vmem>>) attributes {dimension_semantics = [#tpu.dimension_semantics<parallel>], iteration_bounds = array<i64: 1>, scalar_prefetch = 0 : i64, scratch_operands = 0 : i64, tpu.core_type = #tpu.core_type<tc>, window_params = [{transform_indices = @transform_0, window_bounds = array<i64: 2, 1024>}, {transform_indices = @transform_1, window_bounds = array<i64: 4, 2>}, {transform_indices = @transform_2, window_bounds = array<i64: 1, 2>}, {transform_indices = @transform_3, window_bounds = array<i64: 2, 4>}, {transform_indices = @transform_4, window_bounds = array<i64: 1, 4>}, {transform_indices = @transform_5, window_bounds = array<i64: 2, 1024>}]} {
    %c0 = arith.constant 0 : index
    %c0_0 = arith.constant 0 : index
    %0 = vector.load %arg1[%c0, %c0_0] : memref<2x1024xf32, #tpu.memory_space<vmem>>, vector<2x256xf32>
    %cst = arith.constant dense<0.000000e+00> : vector<2xf32>
    %1 = vector.multi_reduction <add>, %0, %cst [1] : vector<2x256xf32> to vector<2xf32>
    %2 = vector.shape_cast %1 : vector<2xf32> to vector<2x1xf32>
    %cst_1 = arith.constant 3.906250e-03 : f32
    %3 = vector.broadcast %cst_1 : f32 to vector<2x1xf32>
    %4 = arith.mulf %2, %3 : vector<2x1xf32>
    %c0_2 = arith.constant 0 : index
    %c256 = arith.constant 256 : index
    %5 = vector.load %arg1[%c0_2, %c256] : memref<2x1024xf32, #tpu.memory_space<vmem>>, vector<2x256xf32>
    %cst_3 = arith.constant dense<0.000000e+00> : vector<2xf32>
    %6 = vector.multi_reduction <add>, %5, %cst_3 [1] : vector<2x256xf32> to vector<2xf32>
    %7 = vector.shape_cast %6 : vector<2xf32> to vector<2x1xf32>
    %cst_4 = arith.constant 3.906250e-03 : f32
    %8 = vector.broadcast %cst_4 : f32 to vector<2x1xf32>
    %9 = arith.mulf %7, %8 : vector<2x1xf32>
    %c0_5 = arith.constant 0 : index
    %c512 = arith.constant 512 : index
    %10 = vector.load %arg1[%c0_5, %c512] : memref<2x1024xf32, #tpu.memory_space<vmem>>, vector<2x256xf32>
    %cst_6 = arith.constant dense<0.000000e+00> : vector<2xf32>
    %11 = vector.multi_reduction <add>, %10, %cst_6 [1] : vector<2x256xf32> to vector<2xf32>
    %12 = vector.shape_cast %11 : vector<2xf32> to vector<2x1xf32>
    %cst_7 = arith.constant 3.906250e-03 : f32
    %13 = vector.broadcast %cst_7 : f32 to vector<2x1xf32>
    %14 = arith.mulf %12, %13 : vector<2x1xf32>
    %c0_8 = arith.constant 0 : index
    %c768 = arith.constant 768 : index
    %15 = vector.load %arg1[%c0_8, %c768] : memref<2x1024xf32, #tpu.memory_space<vmem>>, vector<2x256xf32>
    %cst_9 = arith.constant dense<0.000000e+00> : vector<2xf32>
    %16 = vector.multi_reduction <add>, %15, %cst_9 [1] : vector<2x256xf32> to vector<2xf32>
    %17 = vector.shape_cast %16 : vector<2xf32> to vector<2x1xf32>
    %cst_10 = arith.constant 3.906250e-03 : f32
    %18 = vector.broadcast %cst_10 : f32 to vector<2x1xf32>
    %19 = arith.mulf %17, %18 : vector<2x1xf32>
    %c0_11 = arith.constant 0 : index
    %c0_12 = arith.constant 0 : index
    %20 = memref.load %arg2[%c0_11, %c0_12] : memref<4x2xf32, #tpu.memory_space<smem>>
    %21 = vector.broadcast %20 : f32 to vector<2x1xf32>
    %22 = arith.mulf %4, %21 : vector<2x1xf32>
    %c1 = arith.constant 1 : index
    %c0_13 = arith.constant 0 : index
    %23 = memref.load %arg2[%c1, %c0_13] : memref<4x2xf32, #tpu.memory_space<smem>>
    %24 = vector.broadcast %23 : f32 to vector<2x1xf32>
    %25 = arith.mulf %9, %24 : vector<2x1xf32>
    %26 = arith.addf %22, %25 : vector<2x1xf32>
    %c2 = arith.constant 2 : index
    %c0_14 = arith.constant 0 : index
    %27 = memref.load %arg2[%c2, %c0_14] : memref<4x2xf32, #tpu.memory_space<smem>>
    %28 = vector.broadcast %27 : f32 to vector<2x1xf32>
    %29 = arith.mulf %14, %28 : vector<2x1xf32>
    %30 = arith.addf %26, %29 : vector<2x1xf32>
    %c3 = arith.constant 3 : index
    %c0_15 = arith.constant 0 : index
    %31 = memref.load %arg2[%c3, %c0_15] : memref<4x2xf32, #tpu.memory_space<smem>>
    %32 = vector.broadcast %31 : f32 to vector<2x1xf32>
    %33 = arith.mulf %19, %32 : vector<2x1xf32>
    %34 = arith.addf %30, %33 : vector<2x1xf32>
    %c0_16 = arith.constant 0 : index
    %c0_17 = arith.constant 0 : index
    %35 = memref.load %arg3[%c0_16, %c0_17] : memref<1x2xf32, #tpu.memory_space<smem>>
    %36 = vector.broadcast %35 : f32 to vector<2x1xf32>
    %37 = arith.addf %34, %36 : vector<2x1xf32>
    %cst_18 = arith.constant 0.000000e+00 : f32
    %38 = vector.broadcast %cst_18 : f32 to vector<2x1xf32>
    %39 = arith.maximumf %37, %38 : vector<2x1xf32>
    %c0_19 = arith.constant 0 : index
    %c1_20 = arith.constant 1 : index
    %40 = memref.load %arg2[%c0_19, %c1_20] : memref<4x2xf32, #tpu.memory_space<smem>>
    %41 = vector.broadcast %40 : f32 to vector<2x1xf32>
    %42 = arith.mulf %4, %41 : vector<2x1xf32>
    %c1_21 = arith.constant 1 : index
    %c1_22 = arith.constant 1 : index
    %43 = memref.load %arg2[%c1_21, %c1_22] : memref<4x2xf32, #tpu.memory_space<smem>>
    %44 = vector.broadcast %43 : f32 to vector<2x1xf32>
    %45 = arith.mulf %9, %44 : vector<2x1xf32>
    %46 = arith.addf %42, %45 : vector<2x1xf32>
    %c2_23 = arith.constant 2 : index
    %c1_24 = arith.constant 1 : index
    %47 = memref.load %arg2[%c2_23, %c1_24] : memref<4x2xf32, #tpu.memory_space<smem>>
    %48 = vector.broadcast %47 : f32 to vector<2x1xf32>
    %49 = arith.mulf %14, %48 : vector<2x1xf32>
    %50 = arith.addf %46, %49 : vector<2x1xf32>
    %c3_25 = arith.constant 3 : index
    %c1_26 = arith.constant 1 : index
    %51 = memref.load %arg2[%c3_25, %c1_26] : memref<4x2xf32, #tpu.memory_space<smem>>
    %52 = vector.broadcast %51 : f32 to vector<2x1xf32>
    %53 = arith.mulf %19, %52 : vector<2x1xf32>
    %54 = arith.addf %50, %53 : vector<2x1xf32>
    %c0_27 = arith.constant 0 : index
    %c1_28 = arith.constant 1 : index
    %55 = memref.load %arg3[%c0_27, %c1_28] : memref<1x2xf32, #tpu.memory_space<smem>>
    %56 = vector.broadcast %55 : f32 to vector<2x1xf32>
    %57 = arith.addf %54, %56 : vector<2x1xf32>
    %cst_29 = arith.constant 0.000000e+00 : f32
    %58 = vector.broadcast %cst_29 : f32 to vector<2x1xf32>
    %59 = arith.maximumf %57, %58 : vector<2x1xf32>
    %c0_30 = arith.constant 0 : index
    %c0_31 = arith.constant 0 : index
    %60 = memref.load %arg4[%c0_30, %c0_31] : memref<2x4xf32, #tpu.memory_space<smem>>
    %61 = vector.broadcast %60 : f32 to vector<2x1xf32>
    %62 = arith.mulf %39, %61 : vector<2x1xf32>
    %c1_32 = arith.constant 1 : index
    %c0_33 = arith.constant 0 : index
    %63 = memref.load %arg4[%c1_32, %c0_33] : memref<2x4xf32, #tpu.memory_space<smem>>
    %64 = vector.broadcast %63 : f32 to vector<2x1xf32>
    %65 = arith.mulf %59, %64 : vector<2x1xf32>
    %66 = arith.addf %62, %65 : vector<2x1xf32>
    %c0_34 = arith.constant 0 : index
    %c0_35 = arith.constant 0 : index
    %67 = memref.load %arg5[%c0_34, %c0_35] : memref<1x4xf32, #tpu.memory_space<smem>>
    %68 = vector.broadcast %67 : f32 to vector<2x1xf32>
    %69 = arith.addf %66, %68 : vector<2x1xf32>
    %70 = arith.negf %69 : vector<2x1xf32>
    %71 = math.exp %70 : vector<2x1xf32>
    %cst_36 = arith.constant 1.000000e+00 : f32
    %72 = vector.broadcast %cst_36 : f32 to vector<2x1xf32>
    %73 = arith.addf %72, %71 : vector<2x1xf32>
    %74 = arith.divf %72, %73 : vector<2x1xf32>
    %c0_37 = arith.constant 0 : index
    %c0_38 = arith.constant 0 : index
    %75 = vector.load %arg1[%c0_37, %c0_38] : memref<2x1024xf32, #tpu.memory_space<vmem>>, vector<2x256xf32>
    %76 = vector.broadcast %74 : vector<2x1xf32> to vector<2x256xf32>
    %77 = arith.mulf %75, %76 : vector<2x256xf32>
    %c0_39 = arith.constant 0 : index
    %c0_40 = arith.constant 0 : index
    %78 = vector.load %arg6[%c0_39, %c0_40] : memref<2x1024xf32, #tpu.memory_space<vmem>>, vector<2x256xf32>
    tpu.vector_store %arg6[%c0_39, %c0_40], %77 {strides = array<i32>} : memref<2x1024xf32, #tpu.memory_space<vmem>>, vector<2x256xf32>,
    %c0_41 = arith.constant 0 : index
    %c1_42 = arith.constant 1 : index
    %79 = memref.load %arg4[%c0_41, %c1_42] : memref<2x4xf32, #tpu.memory_space<smem>>
    %80 = vector.broadcast %79 : f32 to vector<2x1xf32>
    %81 = arith.mulf %39, %80 : vector<2x1xf32>
    %c1_43 = arith.constant 1 : index
    %c1_44 = arith.constant 1 : index
    %82 = memref.load %arg4[%c1_43, %c1_44] : memref<2x4xf32, #tpu.memory_space<smem>>
    %83 = vector.broadcast %82 : f32 to vector<2x1xf32>
    %84 = arith.mulf %59, %83 : vector<2x1xf32>
    %85 = arith.addf %81, %84 : vector<2x1xf32>
    %c0_45 = arith.constant 0 : index
    %c1_46 = arith.constant 1 : index
    %86 = memref.load %arg5[%c0_45, %c1_46] : memref<1x4xf32, #tpu.memory_space<smem>>
    %87 = vector.broadcast %86 : f32 to vector<2x1xf32>
    %88 = arith.addf %85, %87 : vector<2x1xf32>
    %89 = arith.negf %88 : vector<2x1xf32>
    %90 = math.exp %89 : vector<2x1xf32>
    %cst_47 = arith.constant 1.000000e+00 : f32
    %91 = vector.broadcast %cst_47 : f32 to vector<2x1xf32>
    %92 = arith.addf %91, %90 : vector<2x1xf32>
    %93 = arith.divf %91, %92 : vector<2x1xf32>
    %c0_48 = arith.constant 0 : index
    %c256_49 = arith.constant 256 : index
    %94 = vector.load %arg1[%c0_48, %c256_49] : memref<2x1024xf32, #tpu.memory_space<vmem>>, vector<2x256xf32>
    %95 = vector.broadcast %93 : vector<2x1xf32> to vector<2x256xf32>
    %96 = arith.mulf %94, %95 : vector<2x256xf32>
    %c0_50 = arith.constant 0 : index
    %c256_51 = arith.constant 256 : index
    %97 = vector.load %arg6[%c0_50, %c256_51] : memref<2x1024xf32, #tpu.memory_space<vmem>>, vector<2x256xf32>
    tpu.vector_store %arg6[%c0_50, %c256_51], %96 {strides = array<i32>} : memref<2x1024xf32, #tpu.memory_space<vmem>>, vector<2x256xf32>,
    %c0_52 = arith.constant 0 : index
    %c2_53 = arith.constant 2 : index
    %98 = memref.load %arg4[%c0_52, %c2_53] : memref<2x4xf32, #tpu.memory_space<smem>>
    %99 = vector.broadcast %98 : f32 to vector<2x1xf32>
    %100 = arith.mulf %39, %99 : vector<2x1xf32>
    %c1_54 = arith.constant 1 : index
    %c2_55 = arith.constant 2 : index
    %101 = memref.load %arg4[%c1_54, %c2_55] : memref<2x4xf32, #tpu.memory_space<smem>>
    %102 = vector.broadcast %101 : f32 to vector<2x1xf32>
    %103 = arith.mulf %59, %102 : vector<2x1xf32>
    %104 = arith.addf %100, %103 : vector<2x1xf32>
    %c0_56 = arith.constant 0 : index
    %c2_57 = arith.constant 2 : index
    %105 = memref.load %arg5[%c0_56, %c2_57] : memref<1x4xf32, #tpu.memory_space<smem>>
    %106 = vector.broadcast %105 : f32 to vector<2x1xf32>
    %107 = arith.addf %104, %106 : vector<2x1xf32>
    %108 = arith.negf %107 : vector<2x1xf32>
    %109 = math.exp %108 : vector<2x1xf32>
    %cst_58 = arith.constant 1.000000e+00 : f32
    %110 = vector.broadcast %cst_58 : f32 to vector<2x1xf32>
    %111 = arith.addf %110, %109 : vector<2x1xf32>
    %112 = arith.divf %110, %111 : vector<2x1xf32>
    %c0_59 = arith.constant 0 : index
    %c512_60 = arith.constant 512 : index
    %113 = vector.load %arg1[%c0_59, %c512_60] : memref<2x1024xf32, #tpu.memory_space<vmem>>, vector<2x256xf32>
    %114 = vector.broadcast %112 : vector<2x1xf32> to vector<2x256xf32>
    %115 = arith.mulf %113, %114 : vector<2x256xf32>
    %c0_61 = arith.constant 0 : index
    %c512_62 = arith.constant 512 : index
    %116 = vector.load %arg6[%c0_61, %c512_62] : memref<2x1024xf32, #tpu.memory_space<vmem>>, vector<2x256xf32>
    tpu.vector_store %arg6[%c0_61, %c512_62], %115 {strides = array<i32>} : memref<2x1024xf32, #tpu.memory_space<vmem>>, vector<2x256xf32>,
    %c0_63 = arith.constant 0 : index
    %c3_64 = arith.constant 3 : index
    %117 = memref.load %arg4[%c0_63, %c3_64] : memref<2x4xf32, #tpu.memory_space<smem>>
    %118 = vector.broadcast %117 : f32 to vector<2x1xf32>
    %119 = arith.mulf %39, %118 : vector<2x1xf32>
    %c1_65 = arith.constant 1 : index
    %c3_66 = arith.constant 3 : index
    %120 = memref.load %arg4[%c1_65, %c3_66] : memref<2x4xf32, #tpu.memory_space<smem>>
    %121 = vector.broadcast %120 : f32 to vector<2x1xf32>
    %122 = arith.mulf %59, %121 : vector<2x1xf32>
    %123 = arith.addf %119, %122 : vector<2x1xf32>
    %c0_67 = arith.constant 0 : index
    %c3_68 = arith.constant 3 : index
    %124 = memref.load %arg5[%c0_67, %c3_68] : memref<1x4xf32, #tpu.memory_space<smem>>
    %125 = vector.broadcast %124 : f32 to vector<2x1xf32>
    %126 = arith.addf %123, %125 : vector<2x1xf32>
    %127 = arith.negf %126 : vector<2x1xf32>
    %128 = math.exp %127 : vector<2x1xf32>
    %cst_69 = arith.constant 1.000000e+00 : f32
    %129 = vector.broadcast %cst_69 : f32 to vector<2x1xf32>
    %130 = arith.addf %129, %128 : vector<2x1xf32>
    %131 = arith.divf %129, %130 : vector<2x1xf32>
    %c0_70 = arith.constant 0 : index
    %c768_71 = arith.constant 768 : index
    %132 = vector.load %arg1[%c0_70, %c768_71] : memref<2x1024xf32, #tpu.memory_space<vmem>>, vector<2x256xf32>
    %133 = vector.broadcast %131 : vector<2x1xf32> to vector<2x256xf32>
    %134 = arith.mulf %132, %133 : vector<2x256xf32>
    %c0_72 = arith.constant 0 : index
    %c768_73 = arith.constant 768 : index
    %135 = vector.load %arg6[%c0_72, %c768_73] : memref<2x1024xf32, #tpu.memory_space<vmem>>, vector<2x256xf32>
    tpu.vector_store %arg6[%c0_72, %c768_73], %134 {strides = array<i32>} : memref<2x1024xf32, #tpu.memory_space<vmem>>, vector<2x256xf32>,
    return
  }
  func.func @transform_0(%arg0: i32) -> (i32, i32) {
    %c0_i32 = arith.constant 0 : i32
    %c0_i32_0 = arith.constant 0 : i32
    return %arg0, %c0_i32 : i32, i32
  }
  func.func @transform_1(%arg0: i32) -> (i32, i32) {
    %c0_i32 = arith.constant 0 : i32
    %c0_i32_0 = arith.constant 0 : i32
    %c0_i32_1 = arith.constant 0 : i32
    return %c0_i32, %c0_i32_0 : i32, i32
  }
  func.func @transform_2(%arg0: i32) -> (i32, i32) {
    %c0_i32 = arith.constant 0 : i32
    %c0_i32_0 = arith.constant 0 : i32
    %c0_i32_1 = arith.constant 0 : i32
    return %c0_i32, %c0_i32_0 : i32, i32
  }
  func.func @transform_3(%arg0: i32) -> (i32, i32) {
    %c0_i32 = arith.constant 0 : i32
    %c0_i32_0 = arith.constant 0 : i32
    %c0_i32_1 = arith.constant 0 : i32
    return %c0_i32, %c0_i32_0 : i32, i32
  }
  func.func @transform_4(%arg0: i32) -> (i32, i32) {
    %c0_i32 = arith.constant 0 : i32
    %c0_i32_0 = arith.constant 0 : i32
    %c0_i32_1 = arith.constant 0 : i32
    return %c0_i32, %c0_i32_0 : i32, i32
  }
  func.func @transform_5(%arg0: i32) -> (i32, i32) {
    %c0_i32 = arith.constant 0 : i32
    %c0_i32_0 = arith.constant 0 : i32
    return %arg0, %c0_i32 : i32, i32
  }
}

</mosaic_0001>

<bundles_post_ra>
// kernel: tpu_custom_call.1
= control target key start
LH: loop header
LB: loop body
LE: loop exit
PB: predicated region body
PF: predicated region fallthrough
CT: control target
= control target key end

     0   :  { %10 = vsyncpa [#allocation3], 0  ;;  %s610_s0 = inlined_call_operand.hbm [shape: f32[2,1024], index: 0, kind: input, shape index: {}]   ;;  %s611_s1 = inlined_call_operand.vmem [shape: f32[4,2], index: 1, kind: input, shape index: {}]   ;;  %s612_s2 = inlined_call_operand.vmem [shape: f32[1,2], index: 2, kind: input, shape index: {}]   ;;  %s613_s3 = inlined_call_operand.vmem [shape: f32[2,4], index: 3, kind: input, shape index: {}]   ;;  %s614_s4 = inlined_call_operand.vmem [shape: f32[1,4], index: 4, kind: input, shape index: {}]   ;;  %s615_s5 = inlined_call_operand.hbm [shape: f32[2,1024], index: 5, kind: output, shape index: {}]  }
   0x1   :  { %11 = vsyncpa [#allocation5], 0 }
   0x2   :  { %12 = vsyncpa [#allocation8], 0 }
   0x3   :  { %13 = vsyncpa [#allocation11], 0  ;;  %s41_s20 = sshll.u32 %s612_s2, 4  ;;  %s42_s20 = int_to_ptr.vmem [resolvable:$true] %s41_s20 }
   0x4   :  { %14 = vsyncpa [#allocation4], 0  ;;  %s370_s21 = scalar_lea.vmem %s42_s20, 16  ;;  %p375_p1 = scmp.lt.s32.totalorder %s42_s20, %s42_s20 }
   0x5   :  { %p371_p0 = scmp.ne.s32.totalorder %s42_s20, %s370_s21  ;;  %p376_p2 = scmp.lt.s32.totalorder %s370_s21, %s370_s21 }
   0x7   :  { %p377_p3 = por %p376_p2, %p375_p1 }
   0x9   :  { %p378_p4 = pnand %p377_p3, %p371_p0 }
   0xb   :  { %381 = shalt.err (!%p378_p4)
}
   0xc   :  { %s472_s22 = smov [#allocation7]   ;;  %s473_s23 = smov [#allocation2]  }
   0xd   :  { %44 = dma.vmem_to_smem %s42_s20, 16, %s472_s22, [#allocation8]  }
   0xe   :  { %s21_s24 = sshll.u32 %s473_s23, 4  ;;  %s31_s27 = sshll.u32 %s611_s1, 4  ;;  %s22_s24 = int_to_ptr.vmem [resolvable:$true] %s21_s24  ;;  %s32_s27 = int_to_ptr.vmem [resolvable:$true] %s31_s27 }
   0xf   :  { %s382_s29 = scalar_lea.hbm %s610_s0, 256 }
  0x10   :  { %p383_p5 = scmp.ne.s32.totalorder %s610_s0, %s382_s29  ;;  %p386_p6 = scmp.lt.u32.totalorder %s382_s29, %s610_s0 }
  0x12   :  { %p388_p7 = pnand %p386_p6, %p383_p5 }
  0x14   :  { %391 = shalt.err (!%p388_p7)
}
  0x15   :  { %s392_s9 = scalar_lea.vmem %s22_s24, 256  ;;  %p397_p9 = scmp.lt.s32.totalorder %s22_s24, %s22_s24 }
  0x16   :  { %p393_p8 = scmp.ne.s32.totalorder %s22_s24, %s392_s9  ;;  %p398_p10 = scmp.lt.s32.totalorder %s392_s9, %s392_s9 }
  0x18   :  { %p399_p11 = por %p398_p10, %p397_p9 }
  0x1a   :  { %p400_p12 = pnand %p399_p11, %p393_p8 }
  0x1c   :  { %403 = shalt.err (!%p400_p12)
}
  0x1d   :  { %24 = dma.hbm_to_vmem [thread:$0]  %s610_s0, 256, %s22_s24, [#allocation3]  }
  0x1e   :  { %s51_s13 = sshll.u32 %s613_s3, 4  ;;  %s404_s14 = scalar_lea.vmem %s32_s27, 64  ;;  %s52_s13 = int_to_ptr.vmem [resolvable:$true] %s51_s13 }
  0x1f   :  { %p405_p13 = scmp.ne.s32.totalorder %s32_s27, %s404_s14  ;;  %p409_p0 = scmp.lt.s32.totalorder %s32_s27, %s32_s27 }
  0x20   :  { %p410_p1 = scmp.lt.s32.totalorder %s404_s14, %s404_s14 }
  0x22   :  { %p411_p2 = por %p410_p1, %p409_p0 }
  0x24   :  { %p412_p3 = pnand %p411_p2, %p405_p13 }
  0x26   :  { %415 = shalt.err (!%p412_p3)
}
  0x27   :  { %s474_s15 = smov [#allocation6]   ;;  %s416_s16 = scalar_lea.vmem %s52_s13, 32 }
  0x28   :  { %34 = dma.vmem_to_smem %s32_s27, 64, %s474_s15, [#allocation5]  }
  0x29   :  { %p417_p4 = scmp.ne.s32.totalorder %s52_s13, %s416_s16  ;;  %p421_p5 = scmp.lt.s32.totalorder %s52_s13, %s52_s13 }
  0x2a   :  { %p422_p6 = scmp.lt.s32.totalorder %s416_s16, %s416_s16 }
  0x2c   :  { %p423_p7 = por %p422_p6, %p421_p5 }
  0x2e   :  { %p424_p8 = pnand %p423_p7, %p417_p4 }
  0x30   :  { %427 = shalt.err (!%p424_p8)
}
  0x31   :  { %s475_s0 = smov [#allocation9]   ;;  %s61_s18 = sshll.u32 %s614_s4, 4  ;;  %s62_s18 = int_to_ptr.vmem [resolvable:$true] %s61_s18 }
  0x32   :  { %54 = dma.vmem_to_smem %s52_s13, 32, %s475_s0, [#allocation8]  }
  0x33   :  { %s428_s19 = scalar_lea.vmem %s62_s18, 16  ;;  %p433_p10 = scmp.lt.s32.totalorder %s62_s18, %s62_s18 }
  0x34   :  { %p429_p9 = scmp.ne.s32.totalorder %s62_s18, %s428_s19  ;;  %p434_p11 = scmp.lt.s32.totalorder %s428_s19, %s428_s19 }
  0x36   :  { %p435_p12 = por %p434_p11, %p433_p10 }
  0x38   :  { %p436_p13 = pnand %p435_p12, %p429_p9 }
  0x3a   :  { %439 = shalt.err (!%p436_p13)
}
  0x3b   :  { %s476_s20 = smov [#allocation10]  }
  0x3c   :  { %64 = dma.vmem_to_smem %s62_s18, 16, %s476_s20, [#allocation11]  }
  0x3d   :  { %462 = dma.done.wait [#allocation3], 256  }
  0x3e   :  { %463 = vsyncadd [#allocation3], 4294967040 }
  0x3f   :  { %464 = dma.done.wait [#allocation5], 64  }
  0x40   :  { %465 = vsyncadd [#allocation5], 4294967232 }
  0x41   :  { %466 = dma.done.wait [#allocation8], 48  }
  0x42   :  { %467 = vsyncadd [#allocation8], 4294967248 }
  0x43   :  { %468 = dma.done.wait [#allocation11], 16  }
  0x44   :  { %469 = vsyncadd [#allocation11], 4294967280 }
  0x45   :  { %80 = sfence }
  0x46   :  { %v86_v0 = vlaneseq  ;;  %v477_v1 = vmov 1983009808   ;;  %vm93_vm0 = vcmask 1041408   ;;  %v537_v7 = vld [vmem:[#allocation2] sm:$0xf]  ;;  %s154_s4 = sld [smem:[#allocation6]] }
  0x47   :  { %v84_v2 = vunpack.c.l.s4 %v477_v1  ;;  %v322_v3 = vld.sshfl [vmem:[#allocation2 + $0x8] sm:$0x33 pattern:$0x76325410]  ;;  %s327_s21 = sld [smem:[#allocation6 + $0x1]]  ;;  %s324_s22 = sld [smem:[#allocation6 + $0x80]] }
  0x48   :  { %v534_v4 = vshrl.u32 %v86_v0, 7  ;;  %v127_v5 = vcombine.high %v322_v3, %v322_v3  ;;  %v130_v6 = vsel %vm93_vm0, %v322_v3, 0.0  ;;  %v323_v9 = vld.sshfl [vmem:[#allocation2 + $0xc] sm:$0x33 pattern:$0x76325410] }
  0x49   :  { %v85_v8 = vunpack.c.0.s8 %v84_v2  ;;  %v321_v11 = vld.sshfl [vmem:[#allocation2 + $0x4] sm:$0x33 pattern:$0x76325410]  ;;  %v145_v12 = vcombine.high %v323_v9, %v323_v9  ;;  %v148_v13 = vsel %vm93_vm0, %v323_v9, 0.0  ;;  %s328_s23 = sld [smem:[#allocation6 + $0x81]] }
  0x4a   :  { %v131_v10 = vsel %vm93_vm0, %v127_v5, 0.0  ;;  %v109_v18 = vcombine.high %v321_v11, %v321_v11  ;;  %v112_v23 = vsel %vm93_vm0, %v321_v11, 0.0  ;;  %s325_s24 = sld [smem:[#allocation6 + $0x100]]  ;;  %s329_s25 = sld [smem:[#allocation6 + $0x101]] }
  0x4b   :  { %v88_v14 = vsub.s32 %v85_v8, %v534_v4  ;;  %v132_v15 = vadd.f32 %v131_v10, %v130_v6  ;;  %v149_v16 = vsel %vm93_vm0, %v145_v12, 0.0  ;;  %s548_s26 = sld [smem:[#allocation6 + $0x180]]  ;;  %s550_s27 = sld [smem:[#allocation6 + $0x181]] }
  0x4c   :  { %v150_v19 = vadd.f32 %v149_v16, %v148_v13  ;;  %v113_v24 = vsel %vm93_vm0, %v109_v18, 0.0  ;;  %v155_v30 = vstv %s154_s4  ;;  %s552_s2 = sld [smem:[#allocation7]]  ;;  %s554_s28 = sld [smem:[#allocation7 + $0x1]] }
  0x4d   :  { %v89_v17 = vrot.slane %v537_v7, %v88_v14  ;;  %133 = vadd.xlane.f32.xlu1 %v132_v15  ;;  %v114_v26 = vadd.f32 %v113_v24, %v112_v23  ;;  %v174_v32 = vstv %s327_s21  ;;  %v158_v34 = vstv %s324_s22  ;;  %s558_s29 = sld [smem:[#allocation9]]  ;;  %s562_s6 = sld [smem:[#allocation9 + $0x1]] }
  0x4e   :  { %s560_s30 = sld [smem:[#allocation9 + $0x80]]  ;;  %s564_s7 = sld [smem:[#allocation9 + $0x81]] }
  0x4f   :  { %v90_v20 = vcombine.high %v89_v17, %v89_v17  ;;  %v94_v21 = vsel %vm93_vm0, %v89_v17, 0.0  ;;  %v177_v35 = vstv %s328_s23  ;;  %s566_s8 = sld [smem:[#allocation9 + $0x2]]  ;;  %s570_s1 = sld [smem:[#allocation9 + $0x3]] }
  0x50   :  { %v162_v37 = vstv %s325_s24  ;;  %v181_v38 = vstv %s329_s25  ;;  %s568_s9 = sld [smem:[#allocation9 + $0x82]]  ;;  %s572_s10 = sld [smem:[#allocation9 + $0x83]] }
  0x51   :  { %v95_v22 = vsel %vm93_vm0, %v90_v20, 0.0  ;;  %151 = vadd.xlane.f32.xlu1 %v150_v19  ;;  %v166_v41 = vstv %s548_s26  ;;  %v185_v42 = vstv %s550_s27  ;;  %s574_s11 = sld [smem:[#allocation10]]  ;;  %s576_s12 = sld [smem:[#allocation10 + $0x1]] }
  0x52   :  { %v96_v25 = vadd.f32 %v95_v22, %v94_v21  ;;  %v170_v55 = vstv %s552_s2  ;;  %v189_v56 = vstv %s554_s28  ;;  %s580_s13 = sld [smem:[#allocation10 + $0x2]]  ;;  %s582_s14 = sld [smem:[#allocation10 + $0x3]] }
  0x53   :  { %v193_v59 = vstv %s558_s29  ;;  %v220_v63 = vstv %s562_s6  ;;  %s479_s15 = smov [#allocation12]  }
  0x54   :  { %97 = vadd.xlane.f32.xlu0 %v96_v25  ;;  %v196_v60 = vstv %s560_s30  ;;  %v223_v0 = vstv %s564_s7  ;;  %s309_s16 = sshll.u32 %s479_s15, 4  ;;  %s310_s16 = int_to_ptr.vmem [resolvable:$true] %s309_s16 }
  0x55   :  { %v248_v1 = vstv %s566_s8  ;;  %v276_v3 = vstv %s570_s1  ;;  %s440_s0 = scalar_lea.vmem %s310_s16, 256  ;;  %p445_p1 = scmp.lt.s32.totalorder %s310_s16, %s310_s16 }
  0x56   :  { %v251_v2 = vstv %s568_s9  ;;  %v279_v5 = vstv %s572_s10  ;;  %p441_p0 = scmp.ne.s32.totalorder %s310_s16, %s440_s0  ;;  %p446_p2 = scmp.lt.s32.totalorder %s440_s0, %s440_s0 }
  0x57   :  { %v200_v9 = vstv %s574_s11  ;;  %v227_v10 = vstv %s576_s12 }
  0x58   :  { %115 = vadd.xlane.f32.xlu0 %v114_v26  ;;  %v255_v19 = vstv %s580_s13  ;;  %v283_v20 = vstv %s582_s14  ;;  %p447_p3 = por %p446_p2, %p445_p1 }
  0x5a   :  { %p448_p4 = pnand %p447_p3, %p441_p0 }
  0xda   :  { %v134_v27 = vpop.xlane.xlu1 %133 }
  0xdb   :  { %v135_v33 = vmul.f32 0.00390625, %v134_v27 }
  0xdd   :  { %v163_v47 = vmul.f32 %v162_v37, %v135_v33  ;;  %v182_v48 = vmul.f32 %v181_v38, %v135_v33  ;;  %v478_v37 = vmov 269488144  }
  0xde   :  { %v152_v29 = vpop.xlane.xlu1 %151  ;;  %v210_v38 = vunpack.c.l.s4 %v478_v37 }
  0xdf   :  { %v153_v40 = vmul.f32 0.00390625, %v152_v29 }
  0xe1   :  { %v98_v28 = vpop.xlane.xlu0 %97  ;;  %v167_v51 = vmul.f32 %v166_v41, %v153_v40  ;;  %v186_v52 = vmul.f32 %v185_v42, %v153_v40 }
  0xe2   :  { %v99_v31 = vmul.f32 0.00390625, %v98_v28 }
  0xe4   :  { %v156_v43 = vmul.f32 %v155_v30, %v99_v31  ;;  %v175_v44 = vmul.f32 %v174_v32, %v99_v31 }
  0xe5   :  { %v116_v36 = vpop.xlane.xlu0 %115 }
  0xe6   :  { %v117_v39 = vmul.f32 0.00390625, %v116_v36 }
  0xe8   :  { %v159_v45 = vmul.f32 %v158_v34, %v117_v39  ;;  %v178_v46 = vmul.f32 %v177_v35, %v117_v39 }
  0xea   :  { %v160_v49 = vadd.f32 %v159_v45, %v156_v43  ;;  %v179_v50 = vadd.f32 %v178_v46, %v175_v44  ;;  %v211_v43 = vunpack.c.0.s8 %v210_v38 }
  0xec   :  { %v164_v53 = vadd.f32 %v163_v47, %v160_v49  ;;  %v183_v54 = vadd.f32 %v182_v48, %v179_v50  ;;  %v214_v44 = vsub.s32 %v211_v43, %v534_v4  ;;  %v235_v48 = vld [vmem:[#allocation2 + $0x4] sm:$0xf] }
  0xee   :  { %v168_v57 = vadd.f32 %v167_v51, %v164_v53  ;;  %v187_v58 = vadd.f32 %v186_v52, %v183_v54  ;;  %v263_v51 = vld [vmem:[#allocation2 + $0x8] sm:$0xf] }
  0xf0   :  { %v171_v61 = vadd.f32 %v170_v55, %v168_v57  ;;  %v190_v62 = vadd.f32 %v189_v56, %v187_v58  ;;  %v291_v55 = vld [vmem:[#allocation2 + $0xc] sm:$0xf] }
  0xf2   :  { %v172_v6 = vmax.f32 %v171_v61, 0.0  ;;  %v191_v8 = vmax.f32 %v190_v62, 0.0 }
  0xf4   :  { %v194_v11 = vmul.f32 %v193_v59, %v172_v6  ;;  %v197_v12 = vmul.f32 %v196_v60, %v191_v8  ;;  %v221_v13 = vmul.f32 %v220_v63, %v172_v6  ;;  %v224_v14 = vmul.f32 %v223_v0, %v191_v8 }
  0xf5   :  { %v249_v15 = vmul.f32 %v248_v1, %v172_v6  ;;  %v252_v16 = vmul.f32 %v251_v2, %v191_v8  ;;  %v277_v17 = vmul.f32 %v276_v3, %v172_v6  ;;  %v280_v18 = vmul.f32 %v279_v5, %v191_v8 }
  0xf6   :  { %v198_v21 = vadd.f32 %v197_v12, %v194_v11  ;;  %v225_v22 = vadd.f32 %v224_v14, %v221_v13 }
  0xf7   :  { %v253_v23 = vadd.f32 %v252_v16, %v249_v15  ;;  %v281_v24 = vadd.f32 %v280_v18, %v277_v17 }
  0xf8   :  { %v201_v25 = vadd.f32 %v200_v9, %v198_v21  ;;  %v228_v26 = vadd.f32 %v227_v10, %v225_v22 }
  0xf9   :  { %v256_v27 = vadd.f32 %v255_v19, %v253_v23  ;;  %v284_v28 = vadd.f32 %v283_v20, %v281_v24 }
  0xfa   :  { %v333_v29 = vmul.f32 -1.442695, %v201_v25  ;;  %v337_v30 = vmul.f32 -1.442695, %v228_v26 }
  0xfb   :  { %v341_v31 = vmul.f32 -1.442695, %v256_v27  ;;  %v345_v32 = vmul.f32 -1.442695, %v284_v28 }
  0xfc   :  { %354 = vpow2.f32 %v333_v29 }
  0xfd   :  { %356 = vpow2.f32 %v337_v30 }
  0xfe   :  { %358 = vpow2.f32 %v341_v31 }
  0xff   :  { %360 = vpow2.f32 %v345_v32 }
 0x106   :  { %v355_v33 = vpop.eup %354 }
 0x107   :  { %v357_v34 = vpop.eup %356  ;;  %v205_v35 = vadd.f32 1.0, %v355_v33 }
 0x108   :  { %v359_v36 = vpop.eup %358  ;;  %v232_v39 = vadd.f32 1.0, %v357_v34 }
 0x109   :  { %v361_v40 = vpop.eup %360  ;;  %362 = vrcp.f32 %v205_v35  ;;  %v260_v41 = vadd.f32 1.0, %v359_v36 }
 0x10a   :  { %364 = vrcp.f32 %v232_v39  ;;  %v288_v42 = vadd.f32 1.0, %v361_v40 }
 0x10b   :  { %366 = vrcp.f32 %v260_v41 }
 0x10c   :  { %368 = vrcp.f32 %v288_v42 }
 0x113   :  { %v363_v45 = vpop.eup %362 }
 0x114   :  { %v365_v46 = vpop.eup %364  ;;  %v215_v47 = vrot.slane %v363_v45, %v214_v44 }
 0x115   :  { %v367_v49 = vpop.eup %366  ;;  %v243_v50 = vrot.slane %v365_v46, %v214_v44 }
 0x116   :  { %v369_v52 = vpop.eup %368  ;;  %v217_v53 = vmul.f32 %v215_v47, %v537_v7  ;;  %v271_v54 = vrot.slane %v367_v49, %v214_v44 }
 0x117   :  { %v245_v56 = vmul.f32 %v243_v50, %v235_v48  ;;  %v299_v57 = vrot.slane %v369_v52, %v214_v44 }
 0x118   :  { %218 = vst [vmem:[#allocation12] sm:$0xf] %v217_v53  ;;  %v273_v58 = vmul.f32 %v271_v54, %v263_v51 }
 0x119   :  { %246 = vst [vmem:[#allocation12 + $0x4] sm:$0xf] %v245_v56  ;;  %v301_v4 = vmul.f32 %v299_v57, %v291_v55 }
 0x11a   :  { %274 = vst [vmem:[#allocation12 + $0x8] sm:$0xf] %v273_v58 }
 0x11b   :  { %302 = vst [vmem:[#allocation12 + $0xc] sm:$0xf] %v301_v4 }
 0x11c   :  { %451 = shalt.err (!%p448_p4)
}
 0x11d   :  { %s452_s18 = scalar_lea.hbm %s615_s5, 256 }
 0x11e   :  { %p453_p5 = scmp.ne.s32.totalorder %s615_s5, %s452_s18  ;;  %p456_p6 = scmp.lt.u32.totalorder %s452_s18, %s615_s5 }
 0x120   :  { %p458_p7 = pnand %p456_p6, %p453_p5 }
 0x122   :  { %461 = shalt.err (!%p458_p7)
}
 0x123   :  { %312 = dma.vmem_to_hbm [thread:$0]  %s310_s16, 256, %s615_s5, [#allocation4]  }
 0x124   :  { %470 = dma.done.wait [#allocation4], 256  }
 0x125   :  { %471 = vsyncadd [#allocation4], 4294967040 }
 0x126   :  { %316 = vsyncpa [#allocation3], 1 }
 0x127   :  { %317 = vsyncpa [#allocation4], 1 }
 0x128   :  { %318 = vsyncpa [#allocation5], 1 }
 0x129   :  { %319 = vsyncpa [#allocation8], 1 }
 0x12a   :  { %320 = vsyncpa [#allocation11], 1 }

</bundles_post_ra>
